<compile_context>
chip_gen: v7x
topology: tpu7x:2x2x1
jax: 0.10.0
libtpu: 0.0.40
codegen_flags: <defaults>
</compile_context>

<pallas_src>
import functools

import jax
import jax.numpy as jnp
from jax.experimental import pallas as pl
from jax.experimental.pallas import tpu as pltpu


def _rmsnorm_kernel(x_ref, w_ref, o_ref, *, eps, h_real):
    # x_ref: (tile_rows, H_pad), w_ref: (1, H_pad), o_ref: (tile_rows, H_pad)
    x_f32 = x_ref[...].astype(jnp.float32)
    # Mean of squares over the *real* hidden width (padded lanes are zero and
    # contribute nothing to the sum).
    variance = jnp.sum(x_f32 * x_f32, axis=-1, keepdims=True) * (1.0 / h_real)
    inv_rms = jax.lax.rsqrt(variance + eps)
    hs = x_f32 * inv_rms  # reuse x_f32; no second cast

    w = w_ref[...]
    if w.dtype in (jnp.float16, jnp.bfloat16):
        # Torch: hidden_states.to(weight.dtype) BEFORE multiplying by weight.
        out = w * hs.astype(w.dtype)
    else:
        out = w.astype(jnp.float32) * hs
    o_ref[...] = out.astype(o_ref.dtype)


def _choose_row_tile(rows, h_pad, in_bytes, out_bytes):
    """Pick a sublane-aligned row tile targeting ~2 MiB per input block."""
    # Sublane packing: 8 rows/vreg for 4-byte dtypes, 16 for 2-byte, 32 for 1-byte.
    sub = max(32 // in_bytes, 32 // out_bytes, 8)
    tile = max((2 << 20) // max(h_pad * in_bytes, 1), 1)
    # Never bigger than (sublane-padded) row count.
    tile = min(tile, pl.cdiv(rows, sub) * sub)
    # For large inputs keep >= ~16 grid steps so pipelining overlaps and the
    # 'parallel' axis can be sharded across both TensorCores on v7x.
    if rows >= 16 * sub:
        tile = min(tile, rows // 16)
    tile = max((tile // sub) * sub, sub)
    return tile


def llama_rmsnorm(hidden_states, weight, eps=1e-6, *, row_tile=None, out_dtype=None):
    """RMSNorm over the last dim of `hidden_states`, scaled by `weight`.

    Matches the PyTorch LlamaRMSNorm forward:
      - variance computed in fp32,
      - normalized states cast to weight dtype iff weight is fp16/bf16,
      - output dtype = weight dtype (half) or fp32-promoted otherwise.
    `out_dtype` may be overridden (e.g. bf16) to cut store traffic when strict
    framework dtype parity is not required.
    """
    orig_shape = hidden_states.shape
    H = orig_shape[-1]
    rows = 1
    for d in orig_shape[:-1]:
        rows *= int(d)

    # Output dtype per the PyTorch reference (unless overridden).
    if out_dtype is None:
        if weight.dtype in (jnp.float16, jnp.bfloat16):
            out_dtype = weight.dtype
        else:
            out_dtype = jnp.promote_types(weight.dtype, jnp.float32)
    out_dtype = jnp.dtype(out_dtype)

    in_bytes = jnp.dtype(hidden_states.dtype).itemsize
    out_bytes = out_dtype.itemsize

    # Pad hidden dim to a lane-dense multiple of 128 (zeros; sliced off after).
    H_pad = pl.cdiv(H, 128) * 128

    if row_tile is None:
        row_tile = _choose_row_tile(rows, H_pad, in_bytes, out_bytes)

    rows_pad = pl.cdiv(rows, row_tile) * row_tile
    grid = (rows_pad // row_tile,)

    x2d = hidden_states.reshape(rows, H)
    w2d = weight.reshape(1, H)
    if H_pad != H:
        x2d = jnp.pad(x2d, ((0, 0), (0, H_pad - H)))
        w2d = jnp.pad(w2d, ((0, 0), (0, H_pad - H)))
    if rows_pad != rows:
        x2d = jnp.pad(x2d, ((0, rows_pad - rows), (0, 0)))

    # Explicit scoped-VMEM budget: double-buffered in/out blocks + weight + slack.
    in_block = row_tile * H_pad * in_bytes
    out_block = row_tile * H_pad * out_bytes
    w_block = H_pad * jnp.dtype(weight.dtype).itemsize
    vmem_limit = max(2 * in_block + 2 * out_block + 2 * w_block + (4 << 20), 32 << 20)

    out2d = pl.pallas_call(
        functools.partial(_rmsnorm_kernel, eps=eps, h_real=float(H)),
        out_shape=jax.ShapeDtypeStruct((rows_pad, H_pad), out_dtype),
        grid_spec=pltpu.PrefetchScalarGridSpec(
            num_scalar_prefetch=0,
            grid=grid,
            in_specs=[
                pl.BlockSpec((row_tile, H_pad), lambda i: (i, 0)),
                pl.BlockSpec((1, H_pad), lambda i: (0, 0)),
            ],
            out_specs=pl.BlockSpec((row_tile, H_pad), lambda i: (i, 0)),
        ),
        compiler_params=pltpu.CompilerParams(
            dimension_semantics=("parallel",),
            vmem_limit_bytes=int(vmem_limit),
        ),
    )(x2d, w2d)

    out2d = out2d[:rows, :H]
    return out2d.reshape(orig_shape[:-1] + (H,))


def _reference_rmsnorm(hidden_states, weight, eps=1e-6):
    # Pure-JAX transcription of the PyTorch module.
    x32 = hidden_states.astype(jnp.float32)
    variance = jnp.mean(x32 * x32, axis=-1, keepdims=True)
    hs = hidden_states.astype(jnp.float32) * jax.lax.rsqrt(variance + eps)
    if weight.dtype in (jnp.float16, jnp.bfloat16):
        hs = hs.astype(weight.dtype)
    return weight * hs


if __name__ == "__main__":
    key = jax.random.PRNGKey(0)
    batch, seq, hidden = 2, 8, 32

    # f32 path (default module config: weight = ones, f32 activations).
    x = jax.random.normal(key, (batch, seq, hidden), dtype=jnp.float32)
    weight = jnp.ones((hidden,), dtype=jnp.float32)
    out = jax.block_until_ready(llama_rmsnorm(x, weight, eps=1e-6))
    ref = _reference_rmsnorm(x, weight, eps=1e-6)
    assert out.shape == ref.shape and out.dtype == ref.dtype, (out.shape, out.dtype)
    assert jnp.allclose(out, ref, atol=1e-5, rtol=1e-5), "f32 mismatch vs reference"

    # bf16 path (weight half-precision -> cast-before-weight-mul semantics).
    xb = x.astype(jnp.bfloat16)
    wb = jnp.ones((hidden,), dtype=jnp.bfloat16)
    outb = jax.block_until_ready(llama_rmsnorm(xb, wb, eps=1e-6))
    refb = _reference_rmsnorm(xb, wb, eps=1e-6)
    assert outb.dtype == refb.dtype == jnp.bfloat16
    assert jnp.allclose(
        outb.astype(jnp.float32), refb.astype(jnp.float32), atol=2e-2, rtol=2e-2
    ), "bf16 mismatch vs reference"

    print("KERNEL_OK")
</pallas_src>

<mosaic_0001>
module attributes {stable_mosaic.version = 11 : i64} {
  func.func @_rmsnorm_kernel(%arg0: i32, %arg1: memref<16x128xf32, #tpu.memory_space<vmem>>, %arg2: memref<1x128xf32, #tpu.memory_space<vmem>>, %arg3: memref<16x128xf32, #tpu.memory_space<vmem>>) attributes {dimension_semantics = [#tpu.dimension_semantics<parallel>], iteration_bounds = array<i64: 1>, scalar_prefetch = 0 : i64, scratch_operands = 0 : i64, tpu.core_type = #tpu.core_type<tc>, window_params = [{transform_indices = @transform_0, window_bounds = array<i64: 16, 128>}, {pipeline_mode = #tpu.pipeline_mode<synchronous>, transform_indices = @transform_1, window_bounds = array<i64: 1, 128>}, {transform_indices = @transform_2, window_bounds = array<i64: 16, 128>}]} {
    %c0 = arith.constant 0 : index
    %c0_0 = arith.constant 0 : index
    %0 = vector.load %arg1[%c0, %c0_0] : memref<16x128xf32, #tpu.memory_space<vmem>>, vector<16x128xf32>
    %1 = arith.mulf %0, %0 : vector<16x128xf32>
    %cst = arith.constant dense<0.000000e+00> : vector<16xf32>
    %2 = vector.multi_reduction <add>, %1, %cst [1] : vector<16x128xf32> to vector<16xf32>
    %3 = vector.shape_cast %2 : vector<16xf32> to vector<16x1xf32>
    %cst_1 = arith.constant 3.125000e-02 : f32
    %4 = vector.broadcast %cst_1 : f32 to vector<16x1xf32>
    %5 = arith.mulf %3, %4 : vector<16x1xf32>
    %cst_2 = arith.constant 9.99999997E-7 : f32
    %6 = vector.broadcast %cst_2 : f32 to vector<16x1xf32>
    %7 = arith.addf %5, %6 : vector<16x1xf32>
    %8 = math.rsqrt %7 : vector<16x1xf32>
    %9 = vector.broadcast %8 : vector<16x1xf32> to vector<16x128xf32>
    %10 = arith.mulf %0, %9 : vector<16x128xf32>
    %c0_3 = arith.constant 0 : index
    %c0_4 = arith.constant 0 : index
    %11 = vector.load %arg2[%c0_3, %c0_4] : memref<1x128xf32, #tpu.memory_space<vmem>>, vector<1x128xf32>
    %12 = vector.broadcast %11 : vector<1x128xf32> to vector<16x128xf32>
    %13 = arith.mulf %12, %10 : vector<16x128xf32>
    %c0_5 = arith.constant 0 : index
    %c0_6 = arith.constant 0 : index
    %14 = vector.load %arg3[%c0_5, %c0_6] : memref<16x128xf32, #tpu.memory_space<vmem>>, vector<16x128xf32>
    tpu.vector_store %arg3[%c0_5, %c0_6], %13 {strides = array<i32>} : memref<16x128xf32, #tpu.memory_space<vmem>>, vector<16x128xf32>,
    return
  }
  func.func @transform_0(%arg0: i32) -> (i32, i32) {
    %c0_i32 = arith.constant 0 : i32
    %c0_i32_0 = arith.constant 0 : i32
    return %arg0, %c0_i32 : i32, i32
  }
  func.func @transform_1(%arg0: i32) -> (i32, i32) {
    %c0_i32 = arith.constant 0 : i32
    %c0_i32_0 = arith.constant 0 : i32
    %c0_i32_1 = arith.constant 0 : i32
    return %c0_i32, %c0_i32_0 : i32, i32
  }
  func.func @transform_2(%arg0: i32) -> (i32, i32) {
    %c0_i32 = arith.constant 0 : i32
    %c0_i32_0 = arith.constant 0 : i32
    return %arg0, %c0_i32 : i32, i32
  }
}

</mosaic_0001>

<bundles_post_ra>
// kernel: tpu_custom_call.1
= control target key start
LH: loop header
LB: loop body
LE: loop exit
PB: predicated region body
PF: predicated region fallthrough
CT: control target
= control target key end

     0   :  { %7 = vsyncpa [#allocation3], 0  ;;  %s179_s0 = inlined_call_operand.hbm [shape: f32[16,128], index: 0, kind: input, shape index: {}]   ;;  %s180_s1 = inlined_call_operand.vmem [shape: f32[1,128], index: 1, kind: input, shape index: {}]   ;;  %s181_s2 = inlined_call_operand.hbm [shape: f32[16,128], index: 2, kind: output, shape index: {}]  }
   0x1   :  { %8 = vsyncpa [#allocation4], 0  ;;  %s127_s9 = smov [#allocation2]   ;;  %s79_s13 = scalar_lea.hbm %s179_s0, 256 }
   0x2   :  { %s14_s10 = sshll.u32 %s127_s9, 4  ;;  %p80_p0 = scmp.ne.s32.totalorder %s179_s0, %s79_s13  ;;  %s15_s10 = int_to_ptr.vmem [resolvable:$true] %s14_s10 }
   0x3   :  { %p83_p1 = scmp.lt.u32.totalorder %s79_s13, %s179_s0 }
   0x5   :  { %p85_p2 = pnand %p83_p1, %p80_p0 }
   0x7   :  { %88 = shalt.err (!%p85_p2)
}
   0x8   :  { %s89_s18 = scalar_lea.vmem %s15_s10, 256  ;;  %p94_p4 = scmp.lt.s32.totalorder %s15_s10, %s15_s10 }
   0x9   :  { %p90_p3 = scmp.ne.s32.totalorder %s15_s10, %s89_s18  ;;  %p95_p5 = scmp.lt.s32.totalorder %s89_s18, %s89_s18 }
   0xb   :  { %p96_p6 = por %p95_p5, %p94_p4 }
   0xd   :  { %p97_p7 = pnand %p96_p6, %p90_p3 }
   0xf   :  { %100 = shalt.err (!%p97_p7)
}
  0x10   :  { %s128_s19 = smov 128   ;;  %s129_s20 = smov 8  }
  0x11   :  { %20 = dma.hbm_to_vmem [thread:$0]  %s179_s0, 256, %s15_s10, [#allocation3], %s128_s19, %s128_s19, %s129_s20  }
  0x12   :  { %123 = dma.done.wait [#allocation3], 256  }
  0x13   :  { %124 = vsyncadd [#allocation3], 4294967040  ;;  %v26_v0 = vld [vmem:[#allocation2] sm:$0xff]  ;;  %v27_v1 = vld [vmem:[#allocation2 + $0x8] sm:$0xff]  ;;  %s130_s0 = smov [#allocation5]  }
  0x14   :  { %v28_v2 = vmul.f32 %v26_v0, %v26_v0  ;;  %v29_v3 = vmul.f32 %v27_v1, %v27_v1  ;;  %v70_v11 = vld [vmem:[%s180_s1] ss:$0 sm:$0xff]  ;;  %s58_s25 = sshll.u32 %s130_s0, 4  ;;  %s59_s25 = int_to_ptr.vmem [resolvable:$true] %s58_s25 }
  0x15   :  { %s101_s26 = scalar_lea.vmem %s59_s25, 256  ;;  %p106_p9 = scmp.lt.s32.totalorder %s59_s25, %s59_s25 }
  0x16   :  { %30 = vadd.xlane.f32.xlu0 %v28_v2  ;;  %p102_p8 = scmp.ne.s32.totalorder %s59_s25, %s101_s26  ;;  %p107_p10 = scmp.lt.s32.totalorder %s101_s26, %s101_s26 }
  0x18   :  { %p108_p11 = por %p107_p10, %p106_p9 }
  0x1a   :  { %32 = vadd.xlane.f32.xlu0 %v29_v3  ;;  %p109_p12 = pnand %p108_p11, %p102_p8 }
  0xa3   :  { %v31_v4 = vpop.xlane.xlu0 %30 }
  0xa4   :  { %v34_v5 = vmul.f32 0.03125, %v31_v4 }
  0xa6   :  { %v36_v6 = vadd.f32 1e-06, %v34_v5 }
  0xa7   :  { %v33_v7 = vpop.xlane.xlu0 %32 }
  0xa8   :  { %75 = vrsqrt.f32 %v36_v6  ;;  %v35_v8 = vmul.f32 0.03125, %v33_v7 }
  0xaa   :  { %v37_v9 = vadd.f32 1e-06, %v35_v8 }
  0xac   :  { %77 = vrsqrt.f32 %v37_v9 }
  0xb2   :  { %v76_v10 = vpop.eup %75 }
  0xb3   :  { %v40_v12 = vmul.f32 %v76_v10, %v26_v0 }
  0xb5   :  { %v49_v13 = vmul.f32 %v70_v11, %v40_v12 }
  0xb6   :  { %v78_v14 = vpop.eup %77 }
  0xb7   :  { %v41_v15 = vmul.f32 %v78_v14, %v27_v1  ;;  %51 = vst [vmem:[#allocation5] sm:$0xff] %v49_v13 }
  0xb9   :  { %v50_v16 = vmul.f32 %v70_v11, %v41_v15 }
  0xbb   :  { %52 = vst [vmem:[#allocation5 + $0x8] sm:$0xff] %v50_v16 }
  0xbc   :  { %112 = shalt.err (!%p109_p12)
}
  0xbd   :  { %s113_s1 = scalar_lea.hbm %s181_s2, 256 }
  0xbe   :  { %p114_p13 = scmp.ne.s32.totalorder %s181_s2, %s113_s1  ;;  %p117_p0 = scmp.lt.u32.totalorder %s113_s1, %s181_s2 }
  0xc0   :  { %p119_p1 = pnand %p117_p0, %p114_p13 }
  0xc2   :  { %122 = shalt.err (!%p119_p1)
}
  0xc3   :  { %64 = dma.vmem_to_hbm [thread:$0]  %s59_s25, 256, %s181_s2, [#allocation4], %s128_s19, %s128_s19, %s129_s20  }
  0xc4   :  { %125 = dma.done.wait [#allocation4], 256  }
  0xc5   :  { %126 = vsyncadd [#allocation4], 4294967040 }
  0xc6   :  { %68 = vsyncpa [#allocation3], 1 }
  0xc7   :  { %69 = vsyncpa [#allocation4], 1 }

</bundles_post_ra>
